<compile_context>
chip_gen: v6e
topology: v6e:2x2x1
jax: 0.10.0
libtpu: 0.0.40
codegen_flags: <defaults>
</compile_context>

<pallas_src>
import jax
import jax.numpy as jnp
from jax import lax
from jax.experimental import pallas as pl
from jax.experimental.pallas import tpu as pltpu


def _round_up(x, m):
    return ((x + m - 1) // m) * m


# ----------------------------- kernel ---------------------------------------


def _sigmoid_f32(x):
    # sigmoid = 1 / (1 + exp(-x)); approx reciprocal keeps the divide off the
    # EUP critical path (the kernel is transcendental-bound for small E).
    return pl.reciprocal(1.0 + jnp.exp(-x), approx=True)


def _decoder_kernel(lhs_ref, rhs_ref, w_ref, b_ref, adj_ref, ops_ref):
    # lhs_ref / rhs_ref: (1, TN, E_pad) bf16 row / col tiles of the embedding
    # w_ref: (E_pad, D_pad) bf16      b_ref: (1, D_pad) f32
    # adj_ref: (1, TN, TN) f32        ops_ref: (1, TN, D_pad) f32
    ei = lhs_ref[0]
    ej = rhs_ref[0]

    # Gram block: contract the last dim of both operands (== e @ e.T) so no
    # explicit transpose (XLU work) is materialized.
    acc = lax.dot_general(
        ei, ej,
        dimension_numbers=(((1,), (1,)), ((), ())),
        preferred_element_type=jnp.float32,
    )
    adj_ref[0] = _sigmoid_f32(acc).astype(adj_ref.dtype)

    # Linear (ops) path fused into the j == 0 column step: the lhs row tile is
    # already resident, so this fills MXU/EUP bubbles of the gram loop.
    @pl.when(pl.program_id(2) == 0)
    def _():
        o = jnp.dot(ei, w_ref[...], preferred_element_type=jnp.float32)
        o = o + b_ref[...]                       # (TN, D_pad) + (1, D_pad)
        ops_ref[0] = _sigmoid_f32(o).astype(ops_ref.dtype)


# ----------------------------- wrapper ---------------------------------------


def _working_set_bytes(tn, e_pad, d_pad):
    return (2 * 2 * tn * e_pad * 2     # lhs + rhs bf16 tiles, double-buffered
            + 2 * e_pad * d_pad * 2    # weight bf16 block, double-buffered
            + 2 * tn * tn * 4          # adj f32 out block, double-buffered
            + 2 * tn * d_pad * 4       # ops f32 out block, double-buffered
            + 2 * d_pad * 4)           # bias


def decoder_forward(embedding, weight, bias):
    """embedding: (B, N, E) f32; weight: (D, E) (PyTorch layout); bias: (D,)."""
    B, N, E = embedding.shape
    D = weight.shape[0]
    f32, bf16 = jnp.float32, jnp.bfloat16

    # Lane-dense padded sizes; N_pad is NOT re-padded up to the tile size.
    E_pad = _round_up(E, 128)
    D_pad = _round_up(D, 128)
    N_pad = _round_up(N, 128)

    # Adaptive TN: largest tile that divides N_pad and fits the VMEM budget
    # (v7x only has 64 MiB physical VMEM; leave headroom for the pipeline).
    budget = 40 * (1 << 20)
    TN = 128
    for tn in (512, 384, 256, 128):
        if N_pad % tn == 0 and _working_set_bytes(tn, E_pad, D_pad) <= budget:
            TN = tn
            break
    # TODO(synk): for very large E_pad * D_pad the resident weight block should
    #             be K-tiled with a VMEM accumulator; not needed at these sizes.
    ws = _working_set_bytes(TN, E_pad, D_pad)
    vmem_limit = int(min(56 * (1 << 20), max(32 * (1 << 20), ws + (4 << 20))))

    gi = N_pad // TN

    # One padded bf16 copy of the embedding feeds both matmul operands
    # (cast fused with the pad; halves every HBM->VMEM DMA stream).
    emb_p = jnp.pad(embedding.astype(bf16),
                    ((0, 0), (0, N_pad - N), (0, E_pad - E)))
    w_t = jnp.pad(weight.astype(bf16).T, ((0, E_pad - E), (0, D_pad - D)))
    b_p = jnp.pad(bias.astype(f32), (0, D_pad - D)).reshape(1, D_pad)

    cost = pl.CostEstimate(
        flops=2 * B * N_pad * N_pad * E_pad + 2 * B * N_pad * E_pad * D_pad,
        transcendentals=B * N_pad * N_pad + B * N_pad * D_pad,
        bytes_accessed=(2 * (2 * B * gi * N_pad * E_pad)      # bf16 emb reads
                        + 2 * E_pad * D_pad                   # bf16 weight
                        + 4 * (B * N_pad * N_pad + B * N_pad * D_pad)),
    )

    adj_pad, ops_pad = pl.pallas_call(
        _decoder_kernel,
        out_shape=(
            jax.ShapeDtypeStruct((B, N_pad, N_pad), f32),
            jax.ShapeDtypeStruct((B, N_pad, D_pad), f32),
        ),
        grid_spec=pltpu.PrefetchScalarGridSpec(
            num_scalar_prefetch=0,
            grid=(B, gi, gi),
            in_specs=[
                pl.BlockSpec((1, TN, E_pad), lambda b, i, j: (b, i, 0)),
                pl.BlockSpec((1, TN, E_pad), lambda b, i, j: (b, j, 0)),
                pl.BlockSpec((E_pad, D_pad), lambda b, i, j: (0, 0)),
                pl.BlockSpec((1, D_pad), lambda b, i, j: (0, 0)),
            ],
            out_specs=[
                pl.BlockSpec((1, TN, TN), lambda b, i, j: (b, i, j)),
                pl.BlockSpec((1, TN, D_pad), lambda b, i, j: (b, i, 0)),
            ],
        ),
        compiler_params=pltpu.CompilerParams(
            # j must be "arbitrary": the ops output block is resident across j
            # and only written at j == 0 (splitting j across v7x cores would
            # race on that block).  b and i stay parallel for megacore.
            dimension_semantics=("parallel", "parallel", "arbitrary"),
            vmem_limit_bytes=vmem_limit,
        ),
        cost_estimate=cost,
    )(emb_p, emb_p, w_t, b_p)

    ops = ops_pad[:, :N, :D]
    adj = adj_pad[:, :N, :N]
    return ops, adj


def decoder_forward_ref(embedding, weight, bias):
    """Pure-JAX f32 reference matching the PyTorch module (eval mode)."""
    ops = jnp.einsum("bne,de->bnd", embedding, weight) + bias
    adj = jnp.einsum("bne,bme->bnm", embedding, embedding)
    return jax.nn.sigmoid(ops), jax.nn.sigmoid(adj)


if __name__ == "__main__":
    # Small shapes: batch=2, num_nodes=8, embedding_dim=32, input_dim=16
    B, N, E, D = 2, 8, 32, 16

    key = jax.random.PRNGKey(0)
    k_emb, k_w, k_b = jax.random.split(key, 3)

    embedding = jax.random.normal(k_emb, (B, N, E), dtype=jnp.float32)

    # Deterministic parameter init (mimicking nn.Linear's uniform init range)
    bound = 1.0 / (E ** 0.5)
    weight = jax.random.uniform(k_w, (D, E), minval=-bound, maxval=bound,
                                dtype=jnp.float32)
    bias = jax.random.uniform(k_b, (D,), minval=-bound, maxval=bound,
                              dtype=jnp.float32)

    ops, adj = decoder_forward(embedding, weight, bias)
    ops = jax.block_until_ready(ops)
    adj = jax.block_until_ready(adj)

    ops_ref, adj_ref = decoder_forward_ref(embedding, weight, bias)

    assert ops.shape == (B, N, D) and adj.shape == (B, N, N)
    # bf16 MXU operands (f32 accumulation) => loosened tolerance vs f32 ref.
    assert jnp.allclose(ops, ops_ref, atol=3e-2, rtol=3e-2), \
        float(jnp.max(jnp.abs(ops - ops_ref)))
    assert jnp.allclose(adj, adj_ref, atol=3e-2, rtol=3e-2), \
        float(jnp.max(jnp.abs(adj - adj_ref)))

    print("KERNEL_OK")
</pallas_src>

<mosaic_0001>
module attributes {stable_mosaic.version = 11 : i64} {
  func.func @_decoder_kernel(%arg0: i32, %arg1: i32, %arg2: i32, %arg3: memref<1x128x128xbf16, #tpu.memory_space<vmem>>, %arg4: memref<1x128x128xbf16, #tpu.memory_space<vmem>>, %arg5: memref<128x128xbf16, #tpu.memory_space<vmem>>, %arg6: memref<1x128xf32, #tpu.memory_space<vmem>>, %arg7: memref<1x128x128xf32, #tpu.memory_space<vmem>>, %arg8: memref<1x128x128xf32, #tpu.memory_space<vmem>>) attributes {dimension_semantics = [#tpu.dimension_semantics<parallel>, #tpu.dimension_semantics<parallel>, #tpu.dimension_semantics<arbitrary>], iteration_bounds = array<i64: 2, 1, 1>, scalar_prefetch = 0 : i64, scratch_operands = 0 : i64, tpu.core_type = #tpu.core_type<tc>, window_params = [{transform_indices = @transform_0, window_bounds = array<i64: 1, 128, 128>}, {transform_indices = @transform_1, window_bounds = array<i64: 1, 128, 128>}, {pipeline_mode = #tpu.pipeline_mode<synchronous>, transform_indices = @transform_2, window_bounds = array<i64: 128, 128>}, {pipeline_mode = #tpu.pipeline_mode<synchronous>, transform_indices = @transform_3, window_bounds = array<i64: 1, 128>}, {transform_indices = @transform_4, window_bounds = array<i64: 1, 128, 128>}, {transform_indices = @transform_5, window_bounds = array<i64: 1, 128, 128>}]} {
    %c0 = arith.constant 0 : index
    %c0_0 = arith.constant 0 : index
    %c0_1 = arith.constant 0 : index
    %0 = vector.load %arg3[%c0, %c0_0, %c0_1] : memref<1x128x128xbf16, #tpu.memory_space<vmem>>, vector<1x128x128xbf16>
    %1 = vector.shape_cast %0 : vector<1x128x128xbf16> to vector<128x128xbf16>
    %c0_2 = arith.constant 0 : index
    %c0_3 = arith.constant 0 : index
    %c0_4 = arith.constant 0 : index
    %2 = vector.load %arg4[%c0_2, %c0_3, %c0_4] : memref<1x128x128xbf16, #tpu.memory_space<vmem>>, vector<1x128x128xbf16>
    %3 = vector.shape_cast %2 : vector<1x128x128xbf16> to vector<128x128xbf16>
    %cst = arith.constant dense<0.000000e+00> : vector<128x128xf32>
    %4 = tpu.matmul %1, %3, %cst {dimension_numbers = #tpu.dot_dimension_numbers<[1], [1], [0], [0], [0, 0, 1, 0], [], []>} : vector<128x128xbf16>, vector<128x128xbf16>, vector<128x128xf32> -> vector<128x128xf32>
    %cst_5 = arith.constant 0.000000e+00 : f32
    %5 = vector.broadcast %cst_5 : f32 to vector<128x128xf32>
    %6 = arith.subf %5, %4 : vector<128x128xf32>
    %7 = math.exp %6 : vector<128x128xf32>
    %cst_6 = arith.constant 1.000000e+00 : f32
    %8 = vector.broadcast %cst_6 : f32 to vector<128x128xf32>
    %9 = arith.addf %8, %7 : vector<128x128xf32>
    %10 = tpu.reciprocal %9 {approx = true} : vector<128x128xf32> -> vector<128x128xf32>
    %c0_7 = arith.constant 0 : index
    %c0_8 = arith.constant 0 : index
    %c0_9 = arith.constant 0 : index
    %11 = vector.load %arg7[%c0_7, %c0_8, %c0_9] : memref<1x128x128xf32, #tpu.memory_space<vmem>>, vector<1x128x128xf32>
    %12 = vector.shape_cast %11 : vector<1x128x128xf32> to vector<128x128xf32>
    %13 = vector.shape_cast %10 : vector<128x128xf32> to vector<1x128x128xf32>
    tpu.vector_store %arg7[%c0_7, %c0_8, %c0_9], %13 {strides = array<i32>} : memref<1x128x128xf32, #tpu.memory_space<vmem>>, vector<1x128x128xf32>,
    %c0_i32 = arith.constant 0 : i32
    %14 = arith.cmpi eq, %arg2, %c0_i32 : i32
    %15 = arith.extui %14 : i1 to i32
    %c0_i32_10 = arith.constant 0 : i32
    %16 = arith.cmpi ne, %15, %c0_i32_10 : i32
    scf.if %16 {
      %c0_11 = arith.constant 0 : index
      %c0_12 = arith.constant 0 : index
      %17 = vector.load %arg5[%c0_11, %c0_12] : memref<128x128xbf16, #tpu.memory_space<vmem>>, vector<128x128xbf16>
      %cst_13 = arith.constant dense<0.000000e+00> : vector<128x128xf32>
      %18 = tpu.matmul %1, %17, %cst_13 {dimension_numbers = #tpu.dot_dimension_numbers<[1], [0], [0], [1], [0, 0, 1, 1], [], []>} : vector<128x128xbf16>, vector<128x128xbf16>, vector<128x128xf32> -> vector<128x128xf32>
      %c0_14 = arith.constant 0 : index
      %c0_15 = arith.constant 0 : index
      %19 = vector.load %arg6[%c0_14, %c0_15] : memref<1x128xf32, #tpu.memory_space<vmem>>, vector<1x128xf32>
      %20 = vector.broadcast %19 : vector<1x128xf32> to vector<128x128xf32>
      %21 = arith.addf %18, %20 : vector<128x128xf32>
      %cst_16 = arith.constant 0.000000e+00 : f32
      %22 = vector.broadcast %cst_16 : f32 to vector<128x128xf32>
      %23 = arith.subf %22, %21 : vector<128x128xf32>
      %24 = math.exp %23 : vector<128x128xf32>
      %cst_17 = arith.constant 1.000000e+00 : f32
      %25 = vector.broadcast %cst_17 : f32 to vector<128x128xf32>
      %26 = arith.addf %25, %24 : vector<128x128xf32>
      %27 = tpu.reciprocal %26 {approx = true} : vector<128x128xf32> -> vector<128x128xf32>
      %c0_18 = arith.constant 0 : index
      %c0_19 = arith.constant 0 : index
      %c0_20 = arith.constant 0 : index
      %28 = vector.load %arg8[%c0_18, %c0_19, %c0_20] : memref<1x128x128xf32, #tpu.memory_space<vmem>>, vector<1x128x128xf32>
      %29 = vector.shape_cast %28 : vector<1x128x128xf32> to vector<128x128xf32>
      %30 = vector.shape_cast %27 : vector<128x128xf32> to vector<1x128x128xf32>
      tpu.vector_store %arg8[%c0_18, %c0_19, %c0_20], %30 {strides = array<i32>} : memref<1x128x128xf32, #tpu.memory_space<vmem>>, vector<1x128x128xf32>,
    } else {
    }
    return
  }
  func.func @transform_0(%arg0: i32, %arg1: i32, %arg2: i32) -> (i32, i32, i32) {
    %c0_i32 = arith.constant 0 : i32
    %c0_i32_0 = arith.constant 0 : i32
    return %arg0, %arg1, %c0_i32 : i32, i32, i32
  }
  func.func @transform_1(%arg0: i32, %arg1: i32, %arg2: i32) -> (i32, i32, i32) {
    %c0_i32 = arith.constant 0 : i32
    %c0_i32_0 = arith.constant 0 : i32
    return %arg0, %arg2, %c0_i32 : i32, i32, i32
  }
  func.func @transform_2(%arg0: i32, %arg1: i32, %arg2: i32) -> (i32, i32) {
    %c0_i32 = arith.constant 0 : i32
    %c0_i32_0 = arith.constant 0 : i32
    %c0_i32_1 = arith.constant 0 : i32
    return %c0_i32, %c0_i32_0 : i32, i32
  }
  func.func @transform_3(%arg0: i32, %arg1: i32, %arg2: i32) -> (i32, i32) {
    %c0_i32 = arith.constant 0 : i32
    %c0_i32_0 = arith.constant 0 : i32
    %c0_i32_1 = arith.constant 0 : i32
    return %c0_i32, %c0_i32_0 : i32, i32
  }
  func.func @transform_4(%arg0: i32, %arg1: i32, %arg2: i32) -> (i32, i32, i32) {
    %c0_i32 = arith.constant 0 : i32
    return %arg0, %arg1, %arg2 : i32, i32, i32
  }
  func.func @transform_5(%arg0: i32, %arg1: i32, %arg2: i32) -> (i32, i32, i32) {
    %c0_i32 = arith.constant 0 : i32
    %c0_i32_0 = arith.constant 0 : i32
    return %arg0, %arg1, %c0_i32 : i32, i32, i32
  }
}

</mosaic_0001>

<bundles_post_ra>
// kernel: tpu_custom_call.1
= control target key start
LH: loop header
LB: loop body
LE: loop exit
PB: predicated region body
PF: predicated region fallthrough
CT: control target
= control target key end

     0   :  { %s2094_s0 = inlined_call_operand.hbm [shape: bf16[2,128,128], index: 0, kind: input, shape index: {}]   ;;  %s2095_s1 = inlined_call_operand.hbm [shape: bf16[2,128,128], index: 1, kind: input, shape index: {}]   ;;  %s2096_s2 = inlined_call_operand.hbm [shape: bf16[128,128], index: 2, kind: input, shape index: {}]   ;;  %s2097_s3 = inlined_call_operand.vmem [shape: f32[1,128], index: 3, kind: input, shape index: {}]   ;;  %s2098_s4 = inlined_call_operand.hbm [shape: f32[2,128,128], index: 4, kind: output, shape index: {0}]   ;;  %s2099_s5 = inlined_call_operand.hbm [shape: f32[2,128,128], index: 5, kind: output, shape index: {1}]  }
   0x1   :  { %2106 = sst [smem:[#allocation19_spill]] %s2096_s2 }
   0x2   :  { %11 = vsyncpa [#allocation3], 0 }
   0x3   :  { %13 = vsyncpa [#allocation3 + $0x1], 0 }
   0x4   :  { %14 = vsyncpa [#allocation6], 0 }
   0x5   :  { %16 = vsyncpa [#allocation6 + $0x1], 0 }
   0x6   :  { %17 = vsyncpa [#allocation4], 0 }
   0x7   :  { %19 = vsyncpa [#allocation4 + $0x1], 0 }
   0x8   :  { %20 = vsyncpa [#allocation10], 0 }
   0x9   :  { %22 = vsyncpa [#allocation10 + $0x1], 0  ;;  %s1766_s18 = smov 0   ;;  %s1768_s19 = smov 0  }
   0xa   :  { %s1770_s20 = smov 0   ;;  %s1772_s21 = smov 0  }
   0xb   :  { %s1774_s22 = smov 0   ;;  %s1776_s23 = smov 0  }
   0xc LB: > { %2107 = sst [smem:[#allocation16_spill]] %s1721_s22  ;;  %s1797_s24 = sadd.s32 4294967295, %s1725_s23   ;;  %s1725_s23 = sphi %s1776_s23, %s28_s23   ;;  %s1721_s22 = sphi %s1774_s22, %s2125_s22   ;;  %s1717_s21 = sphi %s1772_s21, %s2124_s21   ;;  %s1713_s20 = sphi %s1770_s20, %s2128_s20   ;;  %s1709_s19 = sphi %s1768_s19, %s2127_s19   ;;  %s1705_s18 = sphi %s1766_s18, %s2126_s18  }
   0xd   : > { %s1137_s25 = sadd.s32 4294967294, %s1725_s23   ;;  %p69_p0 = scmp.ne.s32.totalorder %s1709_s19, %s1705_s18 }
   0xe   : > { %p70_p1 = scmp.eq.s32.totalorder %s1797_s24, 0  ;;  %p173_p3 = scmp.eq.s32.totalorder %s1137_s25, 1 }
   0xf   : > { %p1138_p5 = scmp.ge.s32.totalorder %s1725_s23, 1  ;;  %p208_p7 = scmp.lt.s32.totalorder %s1725_s23, 3 }
  0x10   : > { %p1806_p4 = por %p70_p1, %p69_p0  ;;  %p1811_p6 = por %p173_p3, %p69_p0 }
  0x11   : > { %p1816_p8 = pnand %p1138_p5, %p208_p7  ;;  %s1727_s29 = smov [#allocation7]  }
  0x12   : > { %s2109_s27 = scalar_select %p1811_p6, 1, 0 }
  0x13   : > { %s220_s30 = sshll.u32 %s1727_s29, 4  ;;  %p1298_p9 = pneg %p1816_p8  ;;  %s221_s30 = int_to_ptr.vmem [resolvable:$true] %s220_s30 }
  0x14   : > { %s47_s7 = sadd.s32 1, %s1721_s22  ;;  %s1536_s8 = scalar_lea.vmem %s221_s30, 1024 }
  0x15   : > { %p1825_p11 = pnand %p1298_p9, %p70_p1  ;;  %p1537_p13 = scmp.ne.s32.totalorder %s221_s30, %s1536_s8 }
  0x16   : > { %p1544_p5 = scmp.lt.s32.totalorder %s221_s30, %s221_s30  ;;  %p1545_p7 = scmp.lt.s32.totalorder %s1536_s8, %s1536_s8 }
  0x17   : > { %p1527_p12 = pneg %p1825_p11 }
  0x18   : > { %p1546_p2 = por %p1545_p7, %p1544_p5 }
  0x19   : > { %p1539_p0 = pnand %p1537_p13, %p1527_p12 }
  0x1b   : > { %p1540_p3 = pneg %p1539_p0 }
  0x1d   : > { %p1547_p6 = pnand %p1546_p2, %p1540_p3 }
  0x1f   : > { %1550 = shalt.err (!%p1547_p6)
}
  0x20   : > { %s2100_s9 = smov 64   ;;  %s2102_s10 = smov 4  }
  0x21   : > { %s2112_s2 = sld [smem:[#allocation19_spill]]  ;;  %p49_p2 = scmp.ge.s32.totalorder %s47_s7, 2 }
  0x22   : > { %s56_s13 = sadd.s32 1, %s1713_s20  ;;  %p63_p6 = scmp.ne.s32.totalorder %s1713_s20, %s1709_s19 }
  0x23   : > { %p64_p9 = scmp.eq.s32.totalorder %s1725_s23, 0  ;;  %s2130_s7 = smov (%p49_p2, %s47_s7), 0 }
  0x24   : > { %2113 = sst [smem:[#allocation17_spill]] %s2130_s7  ;;  %p2115_p13 = scmp.eq.s32.totalorder %s1797_s24, 1 }
  0x25   : > { %p1846_p12 = por %p64_p9, %p63_p6  ;;  %s51_s16 = ssub.s32 %s1721_s22, %s2130_s7 }
  0x26   : > { %p1852_p0 = por %p2115_p13, %p63_p6  ;;  %p1317_p3 = scmp.lt.s32.totalorder %s1725_s23, 2 }
  0x27   : > { %1301 = dma.hbm_to_vmem [thread:$0]  (!%p1825_p11), %s2112_s2, 1024, %s221_s30, [#allocation6], %s2100_s9, %s2100_s9, %s2102_s10  }
  0x28   : > { %p54_p11 = scmp.eq.s32.totalorder %s51_s16, 0  ;;  %s237_s17 = sand.u32 1, %s1713_s20  }
  0x29   : > { %s1141_s25 = sshll.u32 %s237_s17, 6  ;;  %s1186_s30 = sshll.u32 %s1721_s22, 10 }
  0x2a   : > { %s1861_s29 = scalar_select %p54_p11, %s1713_s20, %s56_s13  }
  0x2b   : > { %s249_s11 = scalar_lea.hbm %s2094_s0, %s1186_s30  ;;  %s241_s12 = scalar_lea.vmem [#allocation2], %s1141_s25 }
  0x2c   : > { %2117 = sst [smem:[#allocation18_spill]] %s1861_s29  ;;  %s250_s9 = sshll.u32 %s241_s12, 4  ;;  %s251_s9 = int_to_ptr.vmem [resolvable:$true] %s250_s9 }
  0x2d   : > { %p1869_p5 = pnand %p1317_p3, %p1846_p12  ;;  %s1876_s13 = scalar_lea.hbm %s2095_s1, %s1186_s30 }
  0x2e   : > { %s264_s16 = scalar_lea.vmem [#allocation5], %s1141_s25  ;;  %s238_s29 = scalar_lea.sflag [#allocation3], %s237_s17 }
  0x2f   : > { %s273_s22 = sshll.u32 %s264_s16, 4  ;;  %p1553_p7 = pneg %p1869_p5  ;;  %s274_s22 = int_to_ptr.vmem [resolvable:$true] %s273_s22 }
  0x30   : > { %s1564_s6 = scalar_lea.vmem %s251_s9, 1024  ;;  %s1730_s14 = smov [#allocation2]  }
  0x31   : > { %p1565_p2 = scmp.ne.s32.totalorder %s251_s9, %s1564_s6  ;;  %s1569_s8 = sshll.u32 %s1730_s14, 4  ;;  %s1570_s8 = int_to_ptr.vmem [resolvable:$false] %s1569_s8 }
  0x32   : > { %s1571_s12 = scalar_lea.vmem %s1570_s8, 2048  ;;  %p1572_p12 = scmp.lt.s32.totalorder %s251_s9, %s1570_s8 }
  0x33   : > { %p1567_p6 = pnand %p1565_p2, %p1553_p7  ;;  %p1573_p13 = scmp.lt.s32.totalorder %s1571_s12, %s1564_s6 }
  0x35   : > { %p1568_p9 = pneg %p1567_p6  ;;  %p1574_p3 = por %p1573_p13, %p1572_p12 }
  0x37   : > { %p1575_p11 = pnand %p1574_p3, %p1568_p9 }
  0x39   : > { %1578 = shalt.err (!%p1575_p11)
}
  0x3a   : > { %s2119_s2 = smov 4   ;;  %s2120_s7 = smov 64  }
  0x3b   : > { %1305 = dma.hbm_to_vmem [thread:$0]  (!%p1869_p5), %s249_s11, 1024, %s251_s9, %s238_s29, %s2120_s7, %s2120_s7, %s2119_s2  }
  0x3c   : > { %s260_s17 = sand.u32 1, %s1725_s23   ;;  %s1592_s30 = scalar_lea.vmem %s274_s22, 1024 }
  0x3d   : > { %s261_s25 = scalar_lea.sflag [#allocation6], %s260_s17  ;;  %p1593_p2 = scmp.ne.s32.totalorder %s274_s22, %s1592_s30 }
  0x3e   : > { %s1731_s16 = smov [#allocation5]  }
  0x3f   : > { %p1595_p6 = pnand %p1593_p2, %p1553_p7  ;;  %s1597_s6 = sshll.u32 %s1731_s16, 4  ;;  %s1598_s6 = int_to_ptr.vmem [resolvable:$false] %s1597_s6 }
  0x40   : > { %s1599_s14 = scalar_lea.vmem %s1598_s6, 2048  ;;  %p1600_p9 = scmp.lt.s32.totalorder %s274_s22, %s1598_s6 }
  0x41   : > { %p1596_p10 = pneg %p1595_p6  ;;  %p1601_p12 = scmp.lt.s32.totalorder %s1599_s14, %s1592_s30 }
  0x43   : > { %p1602_p13 = por %p1601_p12, %p1600_p9 }
  0x45   : > { %p1603_p3 = pnand %p1602_p13, %p1596_p10 }
  0x47   : > { %1606 = shalt.err (!%p1603_p3)
}
  0x48   : > { %1308 = dma.hbm_to_vmem [thread:$0]  (!%p1869_p5), %s1876_s13, 1024, %s274_s22, %s261_s25, %s2120_s7, %s2120_s7, %s2119_s2  }
  0x49   : > { %285 = sbr.rel (%p1816_p8) target bundleno = 443 (0x1bb), region = 36  ;;  %s1901_s9 = sand.u32 (!%p1816_p8), 1, %s1709_s19  }
  0x4a   : > { %s1148_s29 = sshll.u32 (!%p1816_p8), %s1901_s9, 6  ;;  %s288_s11 = scalar_lea.sflag (!%p1816_p8), [#allocation3], %s1901_s9 }
  0x4b   : > { %s1905_s8 = scalar_lea.vmem (!%p1816_p8), [#allocation2], %s1148_s29 }
  0x4e   : > { %1684 = dma.done.wait (%p1806_p4), %s288_s11, 1024  }
  0x4f   : > { %1686 = vsyncadd (%p1806_p4), %s288_s11, 4294966272  ;;  %s296_s22 = sand.u32 1, %s1797_s24   ;;  %s1912_s10 = scalar_lea.vmem [#allocation5], %s1148_s29 }
  0x50   : > { %s297_s28 = scalar_lea.sflag [#allocation6], %s296_s22 }
  0x51   : > { %1688 = dma.done.wait (%p1806_p4), %s297_s28, 1024  }
  0x52   : > { %1690 = vsyncadd (%p1806_p4), %s297_s28, 4294966272 }
  0x53   : > { %1692 = dma.done.wait (%p70_p1), [#allocation6], 1024  }
  0x54   : > { %1694 = vsyncadd (%p70_p1), [#allocation6], 4294966272  ;;  %v1373_v0 = vld [vmem:[%s1912_s10 + $0x38] sm:$0xff]   ;;  %v1374_v1 = vld [vmem:[%s1912_s10 + $0x30] sm:$0xff]   ;;  %s1151_s13 = sshll.u32 %s1901_s9, 7  ;;  %s1188_s7 = sshll.u32 %s1717_s21, 11 }
  0x55   : > { %1222 = vmatprep.subr.bf16.mxu0 %v1373_v0  ;;  %v1377_v2 = vld [vmem:[#allocation7 + $0x38] sm:$0xff]   ;;  %v1378_v3 = vld [vmem:[#allocation7 + $0x30] sm:$0xff]   ;;  %v1375_v4 = vld [vmem:[%s1912_s10 + $0x28] sm:$0xff]   ;;  %s1959_s12 = scalar_lea.vmem [#allocation9], %s1151_s13  ;;  %s1979_s2 = scalar_lea.vmem [#allocation8], %s1151_s13 }
  0x56   : > { %1223 = vmatpush3.bf16.xpose.msra.mxu0 %v1373_v0  ;;  %1254 = vmatprep.subr.bf16.mxu1 %v1377_v2  ;;  %v1380_v5 = vld [vmem:[#allocation7 + $0x28] sm:$0xff]   ;;  %v1381_v6 = vld [vmem:[#allocation7 + $0x20] sm:$0xff]   ;;  %v1383_v9 = vld [vmem:[#allocation7 + $0x18] sm:$0xff]   ;;  %s975_s17 = sshll.u32 %s1959_s12, 4  ;;  %s2002_s16 = scalar_lea.hbm %s2099_s5, %s1188_s7  ;;  %s2004_s17 = int_to_ptr.vmem [resolvable:$true] %s975_s17 }
  0x57   : > { %1224 = vmatprep.subr.bf16.mxu0 %v1374_v1  ;;  %1255 = vmatpush3.bf16.msra.mxu1 %v1377_v2  ;;  %v1376_v7 = vld [vmem:[%s1912_s10 + $0x20] sm:$0xff]   ;;  %v1384_v10 = vld [vmem:[#allocation7 + $0x10] sm:$0xff]   ;;  %v1379_v11 = vld [vmem:[%s1912_s10 + $0x18] sm:$0xff]   ;;  %s941_s6 = scalar_lea.sflag [#allocation10], %s1901_s9  ;;  %s1607_s14 = scalar_lea.vmem %s2004_s17, 2048 }
  0x58   : > { %1256 = vmatprep.subr.bf16.mxu1 %v1378_v3  ;;  %v1388_v8 = vld [vmem:[%s1905_s8] sm:$0xff]   ;;  %v1386_v12 = vld [vmem:[#allocation7 + $0x8] sm:$0xff]   ;;  %v1382_v14 = vld [vmem:[%s1912_s10 + $0x10] sm:$0xff]   ;;  %p1608_p1 = scmp.ne.s32.totalorder %s2004_s17, %s1607_s14  ;;  %s1732_s29 = smov [#allocation9]  }
  0x59   : > { %1270 = vmatprep.mubr.bf16.mxu1 %v1388_v8  ;;  %1238 = vmatprep.mubr.bf16.mxu0 %v1388_v8  ;;  %v1387_v13 = vld [vmem:[#allocation7] sm:$0xff]   ;;  %v1390_v15 = vld [vmem:[%s1905_s8 + $0x8] sm:$0xff]   ;;  %v1391_v16 = vld [vmem:[%s1905_s8 + $0x10] sm:$0xff]   ;;  %s1611_s11 = sshll.u32 %s1732_s29, 4  ;;  %s1612_s11 = int_to_ptr.vmem [resolvable:$false] %s1611_s11 }
  0x5a   : > { %v1385_v17 = vld [vmem:[%s1912_s10 + $0x8] sm:$0xff]   ;;  %v1392_v18 = vld [vmem:[%s1905_s8 + $0x18] sm:$0xff]   ;;  %v1393_v19 = vld [vmem:[%s1905_s8 + $0x20] sm:$0xff]   ;;  %p1609_p4 = pnand %p1608_p1, %p1852_p0  ;;  %p1614_p10 = scmp.lt.s32.totalorder %s2004_s17, %s1612_s11 }
  0x5b   : > { %1257 = vmatpush3.bf16.msra.mxu1 %v1378_v3  ;;  %v1389_v20 = vld [vmem:[%s1912_s10] sm:$0xff]   ;;  %v1394_v21 = vld [vmem:[%s1905_s8 + $0x28] sm:$0xff]   ;;  %v1395_v22 = vld [vmem:[%s1905_s8 + $0x30] sm:$0xff]  }
  0x5c   : > { %1258 = vmatprep.subr.bf16.mxu1 %v1380_v5  ;;  %v1396_v23 = vld [vmem:[%s1905_s8 + $0x38] sm:$0xff]   ;;  %v1941_v24 = vld [vmem:[%s2097_s3] ss:$0 sm:$0xff]  ;;  %p1610_p8 = pneg %p1609_p4  ;;  %s1613_s8 = scalar_lea.vmem %s1612_s11, 4096 }
  0x5d   : > { %p1615_p5 = scmp.lt.s32.totalorder %s1613_s8, %s1607_s14 }
  0x5e   : > { %1225 = vmatpush3.bf16.xpose.msra.mxu0 %v1374_v1 }
  0x5f   : > { %1226 = vmatprep.subr.bf16.mxu0 %v1375_v4  ;;  %1259 = vmatpush3.bf16.msra.mxu1 %v1380_v5  ;;  %p1616_p7 = por %p1615_p5, %p1614_p10 }
  0x60   : > { %1260 = vmatprep.subr.bf16.mxu1 %v1381_v6 }
  0x61   : > { %p1617_p11 = pnand %p1616_p7, %p1610_p8 }
  0x63   : > { %1261 = vmatpush3.bf16.msra.mxu1 %v1381_v6 }
  0x64   : > { %1262 = vmatprep.subr.bf16.mxu1 %v1383_v9 }
  0x66   : > { %1227 = vmatpush3.bf16.xpose.msra.mxu0 %v1375_v4 }
  0x67   : > { %1228 = vmatprep.subr.bf16.mxu0 %v1376_v7  ;;  %1263 = vmatpush3.bf16.msra.mxu1 %v1383_v9 }
  0x68   : > { %1264 = vmatprep.subr.bf16.mxu1 %v1384_v10 }
  0x6b   : > { %1265 = vmatpush3.bf16.msra.mxu1 %v1384_v10 }
  0x6c   : > { %1266 = vmatprep.subr.bf16.mxu1 %v1386_v12 }
  0x6e   : > { %1229 = vmatpush3.bf16.xpose.msra.mxu0 %v1376_v7 }
  0x6f   : > { %1230 = vmatprep.subr.bf16.mxu0 %v1379_v11  ;;  %1267 = vmatpush3.bf16.msra.mxu1 %v1386_v12 }
  0x70   : > { %1268 = vmatprep.subr.bf16.mxu1 %v1387_v13 }
  0x73   : > { %1269 = vmatpush3.bf16.msra.mxu1 %v1387_v13 }
  0x76   : > { %1231 = vmatpush3.bf16.xpose.msra.mxu0 %v1379_v11  ;;  %1271 = vmatmul.mubr.bf16.vlgmr.msra.gmra.mxu1 %v1390_v15 }
  0x77   : > { %1232 = vmatprep.subr.bf16.mxu0 %v1382_v14  ;;  %1274 = vmatprep.mubr.bf16.mxu1 %v1391_v16 }
  0x7e   : > { %1233 = vmatpush3.bf16.xpose.msra.mxu0 %v1382_v14  ;;  %1275 = vmatmul.mubr.bf16.gmra.mxu1 %v1392_v18 }
  0x7f   : > { %1234 = vmatprep.subr.bf16.mxu0 %v1385_v17  ;;  %1278 = vmatprep.mubr.bf16.mxu1 %v1393_v19 }
  0x86   : > { %1235 = vmatpush3.bf16.xpose.msra.mxu0 %v1385_v17  ;;  %1279 = vmatmul.mubr.bf16.gmra.mxu1 %v1394_v21 }
  0x87   : > { %1236 = vmatprep.subr.bf16.mxu0 %v1389_v20  ;;  %1282 = vmatprep.mubr.bf16.mxu1 %v1395_v22 }
  0x8e   : > { %1237 = vmatpush3.bf16.xpose.msra.mxu0 %v1389_v20  ;;  %1283 = vmatmul.mubr.bf16.gmra.mxu1 %v1396_v23 }
  0x95   : > { %1239 = vmatmul.mubr.bf16.vlgmr.msra.gmra.mxu0 %v1390_v15 }
  0x96   : > { %1242 = vmatprep.mubr.bf16.mxu0 %v1391_v16 }
  0x9d   : > { %1243 = vmatmul.mubr.bf16.gmra.mxu0 %v1392_v18 }
  0x9e   : > { %1246 = vmatprep.mubr.bf16.mxu0 %v1393_v19 }
  0xa5   : > { %1247 = vmatmul.mubr.bf16.gmra.mxu0 %v1394_v21 }
  0xa6   : > { %1250 = vmatprep.mubr.bf16.mxu0 %v1395_v22 }
  0xad   : > { %1251 = vmatmul.mubr.bf16.gmra.mxu0 %v1396_v23 }
 0x136   : > { %v1272_v25 = vpop.f32.mrf.mxu1 }
 0x137   : > { %v785_v26 = vadd.f32 %v1272_v25, %v1941_v24 }
 0x138   : > { %v776_v27 = vpop.f32.mrf.mxu1 }
 0x139   : > { %v841_v28 = vsub.f32 0.0, %v785_v26  ;;  %v777_v29 = vadd.f32 %v1941_v24, %v776_v27 }
 0x13a   : > { %v1273_v30 = vpop.f32.mrf.mxu1 }
 0x13b   : > { %v859_v31 = vmul.f32 1.442695, %v841_v28  ;;  %v839_v32 = vsub.f32 0.0, %v777_v29  ;;  %v788_v33 = vadd.f32 %v1273_v30, %v1941_v24 }
 0x13c   : > { %v779_v34 = vpop.f32.mrf.mxu1 }
 0x13d   : > { %1397 = vpow2.f32 %v859_v31  ;;  %v855_v35 = vmul.f32 1.442695, %v839_v32  ;;  %v842_v36 = vsub.f32 0.0, %v788_v33  ;;  %v780_v37 = vadd.f32 %v1941_v24, %v779_v34 }
 0x13e   : > { %v1276_v38 = vpop.f32.mrf.mxu1 }
 0x13f   : > { %1399 = vpow2.f32 %v855_v35  ;;  %v861_v39 = vmul.f32 1.442695, %v842_v36  ;;  %v840_v40 = vsub.f32 0.0, %v780_v37  ;;  %v801_v41 = vadd.f32 %v1276_v38, %v1941_v24 }
 0x140   : > { %v792_v42 = vpop.f32.mrf.mxu1 }
 0x141   : > { %1401 = vpow2.f32 %v861_v39  ;;  %v857_v43 = vmul.f32 1.442695, %v840_v40  ;;  %v845_v44 = vsub.f32 0.0, %v801_v41  ;;  %v793_v45 = vadd.f32 %v1941_v24, %v792_v42 }
 0x142   : > { %v1277_v46 = vpop.f32.mrf.mxu1 }
 0x143   : > { %1403 = vpow2.f32 %v857_v43  ;;  %v867_v47 = vmul.f32 1.442695, %v845_v44  ;;  %v843_v48 = vsub.f32 0.0, %v793_v45  ;;  %v804_v49 = vadd.f32 %v1277_v46, %v1941_v24 }
 0x144   : > { %v795_v50 = vpop.f32.mrf.mxu1 }
 0x145   : > { %1405 = vpow2.f32 %v867_v47  ;;  %v863_v51 = vmul.f32 1.442695, %v843_v48  ;;  %v846_v52 = vsub.f32 0.0, %v804_v49  ;;  %v796_v53 = vadd.f32 %v1941_v24, %v795_v50 }
 0x146   : > { %v1280_v54 = vpop.f32.mrf.mxu1 }
 0x147   : > { %1407 = vpow2.f32 %v863_v51  ;;  %v869_v55 = vmul.f32 1.442695, %v846_v52  ;;  %v844_v56 = vsub.f32 0.0, %v796_v53  ;;  %v817_v57 = vadd.f32 %v1280_v54, %v1941_v24 }
 0x148   : > { %v808_v58 = vpop.f32.mrf.mxu1 }
 0x149   : > { %1409 = vpow2.f32 %v869_v55  ;;  %v865_v59 = vmul.f32 1.442695, %v844_v56  ;;  %v849_v60 = vsub.f32 0.0, %v817_v57  ;;  %v809_v61 = vadd.f32 %v1941_v24, %v808_v58 }
 0x14a   : > { %v1398_v62 = vpop.eup %1397  ;;  %v1281_v63 = vpop.f32.mrf.mxu1 }
 0x14b   : > { %v889_v0 = vadd.f32 1.0, %v1398_v62  ;;  %1411 = vpow2.f32 %v865_v59  ;;  %v875_v1 = vmul.f32 1.442695, %v849_v60  ;;  %v847_v2 = vsub.f32 0.0, %v809_v61 }
 0x14c   : > { %v1400_v3 = vpop.eup %1399  ;;  %v820_v4 = vadd.f32 %v1281_v63, %v1941_v24  ;;  %v811_v5 = vpop.f32.mrf.mxu1 }
 0x14d   : > { %1413 = vrcp.f32 %v889_v0  ;;  %v887_v6 = vadd.f32 1.0, %v1400_v3  ;;  %v871_v7 = vmul.f32 1.442695, %v847_v2  ;;  %v812_v8 = vadd.f32 %v1941_v24, %v811_v5 }
 0x14e   : > { %v1402_v9 = vpop.eup %1401  ;;  %1415 = vpow2.f32 %v875_v1  ;;  %v850_v10 = vsub.f32 0.0, %v820_v4  ;;  %v1284_v11 = vpop.f32.mrf.mxu1 }
 0x14f   : > { %1417 = vrcp.f32 %v887_v6  ;;  %v890_v12 = vadd.f32 1.0, %v1402_v9  ;;  %v848_v13 = vsub.f32 0.0, %v812_v8  ;;  %v833_v14 = vadd.f32 %v1284_v11, %v1941_v24 }
 0x150   : > { %v1404_v15 = vpop.eup %1403  ;;  %1419 = vpow2.f32 %v871_v7  ;;  %v877_v16 = vmul.f32 1.442695, %v850_v10  ;;  %v824_v52 = vpop.f32.mrf.mxu1 }
 0x151   : > { %1421 = vrcp.f32 %v890_v12  ;;  %v888_v17 = vadd.f32 1.0, %v1404_v15  ;;  %v873_v18 = vmul.f32 1.442695, %v848_v13  ;;  %v853_v19 = vsub.f32 0.0, %v833_v14 }
 0x152   : > { %v1406_v20 = vpop.eup %1405  ;;  %1423 = vpow2.f32 %v877_v16  ;;  %v825_v62 = vadd.f32 %v1941_v24, %v824_v52  ;;  %v1285_v2 = vpop.f32.mrf.mxu1 }
 0x153   : > { %1425 = vrcp.f32 %v888_v17  ;;  %v893_v23 = vadd.f32 1.0, %v1406_v20  ;;  %v883_v25 = vmul.f32 1.442695, %v853_v19  ;;  %v836_v13 = vadd.f32 %v1285_v2, %v1941_v24 }
 0x154   : > { %v1408_v26 = vpop.eup %1407  ;;  %1427 = vpow2.f32 %v873_v18  ;;  %v851_v12 = vsub.f32 0.0, %v825_v62  ;;  %v827_v18 = vpop.f32.mrf.mxu1 }
 0x155   : > { %v1240_v21 = vpop.f32.mrf.mxu0  ;;  %1429 = vrcp.f32 %v893_v23  ;;  %v891_v30 = vadd.f32 1.0, %v1408_v26 }
 0x156   : > { %v573_v22 = vsub.f32 0.0, %v1240_v21  ;;  %v1410_v31 = vpop.eup %1409  ;;  %1431 = vpow2.f32 %v883_v25 }
 0x157   : > { %v508_v27 = vpop.f32.mrf.mxu0  ;;  %v894_v35 = vadd.f32 1.0, %v1410_v31 }
 0x158   : > { %v591_v28 = vmul.f32 1.442695, %v573_v22  ;;  %v571_v29 = vsub.f32 0.0, %v508_v27  ;;  %v1412_v36 = vpop.eup %1411  ;;  %v879_v27 = vmul.f32 1.442695, %v851_v12 }
 0x159   : > { %v1241_v32 = vpop.f32.mrf.mxu0  ;;  %v892_v40 = vadd.f32 1.0, %v1412_v36 }
 0x15a   : > { %1433 = vpow2.f32 %v591_v28  ;;  %v587_v33 = vmul.f32 1.442695, %v571_v29  ;;  %v574_v34 = vsub.f32 0.0, %v1241_v32  ;;  %v1414_v41 = vpop.eup %1413  ;;  %v854_v28 = vsub.f32 0.0, %v836_v13 }
 0x15b   : > { %1435 = vrcp.f32 %v891_v30  ;;  %v511_v37 = vpop.f32.mrf.mxu0  ;;  %v1416_v43 = vpop.eup %1415  ;;  %921 = vst [vmem:[%s1959_s12 + $0x10] sm:$0xff] %v1414_v41  ;;  %v828_v30 = vadd.f32 %v1941_v24, %v827_v18 }
 0x15c   : > { %1437 = vpow2.f32 %v587_v33  ;;  %v593_v38 = vmul.f32 1.442695, %v574_v34  ;;  %v572_v39 = vsub.f32 0.0, %v511_v37  ;;  %v1418_v46 = vpop.eup %1417  ;;  %v897_v47 = vadd.f32 1.0, %v1416_v43 }
 0x15d   : > { %1439 = vrcp.f32 %v894_v35  ;;  %v1244_v42 = vpop.f32.mrf.mxu0  ;;  %v1420_v49 = vpop.eup %1419  ;;  %919 = vst [vmem:[%s1959_s12] sm:$0xff] %v1418_v46  ;;  %v852_v41 = vsub.f32 0.0, %v828_v30 }
 0x15e   : > { %1441 = vpow2.f32 %v593_v38  ;;  %v589_v44 = vmul.f32 1.442695, %v572_v39  ;;  %v577_v45 = vsub.f32 0.0, %v1244_v42  ;;  %v1422_v53 = vpop.eup %1421  ;;  %v895_v54 = vadd.f32 1.0, %v1420_v49 }
 0x15f   : > { %1443 = vrcp.f32 %v892_v40  ;;  %v524_v48 = vpop.f32.mrf.mxu0  ;;  %v1424_v56 = vpop.eup %1423  ;;  %922 = vst [vmem:[%s1959_s12 + $0x18] sm:$0xff] %v1422_v53  ;;  %v885_v40 = vmul.f32 1.442695, %v854_v28  ;;  %v881_v52 = vmul.f32 1.442695, %v852_v41 }
 0x160   : > { %1445 = vpow2.f32 %v589_v44  ;;  %v599_v50 = vmul.f32 1.442695, %v577_v45  ;;  %v575_v51 = vsub.f32 0.0, %v524_v48  ;;  %v1426_v59 = vpop.eup %1425  ;;  %v898_v60 = vadd.f32 1.0, %v1424_v56 }
 0x161   : > { %1447 = vrcp.f32 %v897_v47  ;;  %v1245_v55 = vpop.f32.mrf.mxu0  ;;  %v1428_v63 = vpop.eup %1427  ;;  %920 = vst [vmem:[%s1959_s12 + $0x8] sm:$0xff] %v1426_v59 }
 0x162   : > { %1449 = vpow2.f32 %v599_v50  ;;  %v595_v57 = vmul.f32 1.442695, %v575_v51  ;;  %v578_v58 = vsub.f32 0.0, %v1245_v55  ;;  %v1430_v3 = vpop.eup %1429  ;;  %v896_v4 = vadd.f32 1.0, %v1428_v63 }
 0x163   : > { %1451 = vrcp.f32 %v895_v54  ;;  %v527_v61 = vpop.f32.mrf.mxu0  ;;  %v1432_v6 = vpop.eup %1431  ;;  %925 = vst [vmem:[%s1959_s12 + $0x30] sm:$0xff] %v1430_v3 }
 0x164   : > { %1453 = vpow2.f32 %v595_v57  ;;  %v601_v0 = vmul.f32 1.442695, %v578_v58  ;;  %v576_v1 = vsub.f32 0.0, %v527_v61  ;;  %v901_v10 = vadd.f32 1.0, %v1432_v6 }
 0x165   : > { %1455 = vrcp.f32 %v898_v60  ;;  %v1248_v5 = vpop.f32.mrf.mxu0 }
 0x166   : > { %1457 = vpow2.f32 %v601_v0  ;;  %v597_v7 = vmul.f32 1.442695, %v576_v1  ;;  %v581_v8 = vsub.f32 0.0, %v1248_v5 }
 0x167   : > { %v1434_v9 = vpop.eup %1433  ;;  %1459 = vrcp.f32 %v896_v4  ;;  %v540_v11 = vpop.f32.mrf.mxu0 }
 0x168   : > { %v1436_v14 = vpop.eup %1435  ;;  %v621_v15 = vadd.f32 1.0, %v1434_v9  ;;  %1461 = vpow2.f32 %v597_v7  ;;  %v607_v16 = vmul.f32 1.442695, %v581_v8  ;;  %v579_v17 = vsub.f32 0.0, %v540_v11 }
 0x169   : > { %v1438_v19 = vpop.eup %1437  ;;  %923 = vst [vmem:[%s1959_s12 + $0x20] sm:$0xff] %v1436_v14  ;;  %1463 = vrcp.f32 %v901_v10  ;;  %v1249_v20 = vpop.f32.mrf.mxu0 }
 0x16a   : > { %v1440_v21 = vpop.eup %1439  ;;  %1465 = vrcp.f32 %v621_v15  ;;  %v619_v22 = vadd.f32 1.0, %v1438_v19  ;;  %v603_v23 = vmul.f32 1.442695, %v579_v17  ;;  %v582_v25 = vsub.f32 0.0, %v1249_v20 }
 0x16b   : > { %v1442_v26 = vpop.eup %1441  ;;  %926 = vst [vmem:[%s1959_s12 + $0x38] sm:$0xff] %v1440_v21  ;;  %1467 = vpow2.f32 %v607_v16  ;;  %v543_v29 = vpop.f32.mrf.mxu0 }
 0x16c   : > { %v1444_v31 = vpop.eup %1443  ;;  %1469 = vrcp.f32 %v619_v22  ;;  %v622_v32 = vadd.f32 1.0, %v1442_v26  ;;  %v609_v34 = vmul.f32 1.442695, %v582_v25  ;;  %v580_v35 = vsub.f32 0.0, %v543_v29 }
 0x16d   : > { %v1446_v33 = vpop.eup %1445  ;;  %924 = vst [vmem:[%s1959_s12 + $0x28] sm:$0xff] %v1444_v31  ;;  %1471 = vpow2.f32 %v603_v23  ;;  %v1252_v36 = vpop.f32.mrf.mxu0 }
 0x16e   : > { %v1448_v37 = vpop.eup %1447  ;;  %1473 = vrcp.f32 %v622_v32  ;;  %v620_v38 = vadd.f32 1.0, %v1446_v33  ;;  %v605_v45 = vmul.f32 1.442695, %v580_v35  ;;  %v585_v46 = vsub.f32 0.0, %v1252_v36 }
 0x16f   : > { %v1450_v39 = vpop.eup %1449  ;;  %929 = vst [vmem:[%s1959_s12 + $0x50] sm:$0xff] %v1448_v37  ;;  %1475 = vpow2.f32 %v879_v27  ;;  %v556_v24 = vpop.f32.mrf.mxu0 }
 0x170   : > { %v1452_v42 = vpop.eup %1451  ;;  %1477 = vrcp.f32 %v620_v38  ;;  %v625_v43 = vadd.f32 1.0, %v1450_v39  ;;  %v583_v50 = vsub.f32 0.0, %v556_v24  ;;  %v615_v58 = vmul.f32 1.442695, %v585_v46 }
 0x171   : > { %v1454_v44 = vpop.eup %1453  ;;  %927 = vst [vmem:[%s1959_s12 + $0x40] sm:$0xff] %v1452_v42  ;;  %1479 = vpow2.f32 %v609_v34  ;;  %v1253_v47 = vpop.f32.mrf.mxu0 }
 0x172   : > { %v1456_v48 = vpop.eup %1455  ;;  %1481 = vrcp.f32 %v625_v43  ;;  %v623_v49 = vadd.f32 1.0, %v1454_v44  ;;  %v586_v56 = vsub.f32 0.0, %v1253_v47  ;;  %v611_v61 = vmul.f32 1.442695, %v583_v50 }
 0x173   : > { %v1458_v51 = vpop.eup %1457  ;;  %930 = vst [vmem:[%s1959_s12 + $0x58] sm:$0xff] %v1456_v48  ;;  %1483 = vpow2.f32 %v885_v40  ;;  %v559_v53 = vpop.f32.mrf.mxu0 }
 0x174   : > { %v1460_v54 = vpop.eup %1459  ;;  %1485 = vrcp.f32 %v623_v49  ;;  %v626_v55 = vadd.f32 1.0, %v1458_v51  ;;  %v584_v62 = vsub.f32 0.0, %v559_v53  ;;  %v617_v1 = vmul.f32 1.442695, %v586_v56 }
 0x175   : > { %v1462_v57 = vpop.eup %1461  ;;  %928 = vst [vmem:[%s1959_s12 + $0x48] sm:$0xff] %v1460_v54  ;;  %1487 = vpow2.f32 %v605_v45 }
 0x176   : > { %v1464_v59 = vpop.eup %1463  ;;  %1489 = vrcp.f32 %v626_v55  ;;  %v624_v60 = vadd.f32 1.0, %v1462_v57  ;;  %v613_v5 = vmul.f32 1.442695, %v584_v62 }
 0x177   : > { %v1466_v63 = vpop.eup %1465  ;;  %933 = vst [vmem:[%s1959_s12 + $0x70] sm:$0xff] %v1464_v59  ;;  %1491 = vpow2.f32 %v881_v52 }
 0x178   : > { %v1468_v0 = vpop.eup %1467  ;;  %653 = vst [vmem:[%s1979_s2 + $0x10] sm:$0xff] %v1466_v63  ;;  %1493 = vrcp.f32 %v624_v60 }
 0x179   : > { %v1470_v2 = vpop.eup %1469  ;;  %v629_v3 = vadd.f32 1.0, %v1468_v0  ;;  %1495 = vpow2.f32 %v615_v58 }
 0x17a   : > { %v1472_v4 = vpop.eup %1471  ;;  %651 = vst [vmem:[%s1979_s2] sm:$0xff] %v1470_v2  ;;  %1497 = vpow2.f32 %v611_v61 }
 0x17b   : > { %v1474_v6 = vpop.eup %1473  ;;  %1499 = vrcp.f32 %v629_v3  ;;  %v627_v7 = vadd.f32 1.0, %v1472_v4 }
 0x17c   : > { %v1476_v8 = vpop.eup %1475  ;;  %654 = vst [vmem:[%s1979_s2 + $0x18] sm:$0xff] %v1474_v6  ;;  %1501 = vpow2.f32 %v617_v1 }
 0x17d   : > { %v1478_v9 = vpop.eup %1477  ;;  %1503 = vrcp.f32 %v627_v7  ;;  %v899_v10 = vadd.f32 1.0, %v1476_v8 }
 0x17e   : > { %v1480_v11 = vpop.eup %1479  ;;  %652 = vst [vmem:[%s1979_s2 + $0x8] sm:$0xff] %v1478_v9  ;;  %1505 = vpow2.f32 %v613_v5 }
 0x17f   : > { %v1482_v12 = vpop.eup %1481  ;;  %1507 = vrcp.f32 %v899_v10  ;;  %v630_v13 = vadd.f32 1.0, %v1480_v11 }
 0x180   : > { %v1484_v14 = vpop.eup %1483  ;;  %657 = vst [vmem:[%s1979_s2 + $0x30] sm:$0xff] %v1482_v12 }
 0x181   : > { %v1486_v15 = vpop.eup %1485  ;;  %1509 = vrcp.f32 %v630_v13  ;;  %v902_v16 = vadd.f32 1.0, %v1484_v14 }
 0x182   : > { %v1488_v17 = vpop.eup %1487  ;;  %655 = vst [vmem:[%s1979_s2 + $0x20] sm:$0xff] %v1486_v15 }
 0x183   : > { %v1490_v18 = vpop.eup %1489  ;;  %1511 = vrcp.f32 %v902_v16  ;;  %v628_v19 = vadd.f32 1.0, %v1488_v17 }
 0x184   : > { %v1492_v20 = vpop.eup %1491  ;;  %658 = vst [vmem:[%s1979_s2 + $0x38] sm:$0xff] %v1490_v18 }
 0x185   : > { %v1494_v21 = vpop.eup %1493  ;;  %1513 = vrcp.f32 %v628_v19  ;;  %v900_v22 = vadd.f32 1.0, %v1492_v20 }
 0x186   : > { %v1496_v23 = vpop.eup %1495  ;;  %656 = vst [vmem:[%s1979_s2 + $0x28] sm:$0xff] %v1494_v21 }
 0x187   : > { %v1498_v25 = vpop.eup %1497  ;;  %1515 = vrcp.f32 %v900_v22  ;;  %v633_v26 = vadd.f32 1.0, %v1496_v23 }
 0x188   : > { %v1500_v27 = vpop.eup %1499  ;;  %v631_v28 = vadd.f32 1.0, %v1498_v25 }
 0x189   : > { %v1502_v29 = vpop.eup %1501  ;;  %661 = vst [vmem:[%s1979_s2 + $0x50] sm:$0xff] %v1500_v27  ;;  %1517 = vrcp.f32 %v633_v26 }
 0x18a   : > { %v1504_v30 = vpop.eup %1503  ;;  %1519 = vrcp.f32 %v631_v28  ;;  %v634_v31 = vadd.f32 1.0, %v1502_v29 }
 0x18b   : > { %v1506_v32 = vpop.eup %1505  ;;  %659 = vst [vmem:[%s1979_s2 + $0x40] sm:$0xff] %v1504_v30 }
 0x18c   : > { %v1508_v33 = vpop.eup %1507  ;;  %1521 = vrcp.f32 %v634_v31  ;;  %v632_v34 = vadd.f32 1.0, %v1506_v32 }
 0x18d   : > { %931 = vst [vmem:[%s1959_s12 + $0x60] sm:$0xff] %v1508_v33 }
 0x18e   : > { %v1510_v35 = vpop.eup %1509  ;;  %1523 = vrcp.f32 %v632_v34 }
 0x18f   : > { %662 = vst [vmem:[%s1979_s2 + $0x58] sm:$0xff] %v1510_v35 }
 0x190   : > { %v1512_v36 = vpop.eup %1511 }
 0x191   : > { %934 = vst [vmem:[%s1959_s12 + $0x78] sm:$0xff] %v1512_v36 }
 0x192   : > { %v1514_v37 = vpop.eup %1513 }
 0x193   : > { %660 = vst [vmem:[%s1979_s2 + $0x48] sm:$0xff] %v1514_v37 }
 0x194   : > { %v1516_v38 = vpop.eup %1515 }
 0x195   : > { %932 = vst [vmem:[%s1959_s12 + $0x68] sm:$0xff] %v1516_v38 }
 0x196   : > { %v1518_v39 = vpop.eup %1517 }
 0x197   : > { %1620 = shalt.err (!%p1617_p11)
}
 0x198   : > { %s1621_s22 = scalar_lea.hbm %s2002_s16, 2048  ;;  %s1625_s24 = scalar_lea.hbm %s2099_s5, 4096 }
 0x199   : > { %p1622_p2 = scmp.ne.s32.totalorder %s2002_s16, %s1621_s22  ;;  %p1626_p12 = scmp.lt.s32.totalorder %s2002_s16, %s2099_s5 }
 0x19a   : > { %p1627_p13 = scmp.lt.s32.totalorder %s1625_s24, %s1621_s22 }
 0x19b   : > { %p1623_p6 = pnand %p1622_p2, %p1852_p0 }
 0x19c   : > { %p1628_p3 = por %p1627_p13, %p1626_p12 }
 0x19d   : > { %p1624_p9 = pneg %p1623_p6 }
 0x19f   : > { %p1629_p1 = pnand %p1628_p3, %p1624_p9 }
 0x1a1   : > { %1632 = shalt.err (!%p1629_p1)
}
 0x1a2   : > { %s1733_s12 = smov 128   ;;  %s1734_s25 = smov 8   ;;  %v1520_v40 = vpop.eup %1519  ;;  %665 = vst [vmem:[%s1979_s2 + $0x70] sm:$0xff] %v1518_v39 }
 0x1a3   : > { %1295 = dma.vmem_to_hbm [thread:$0]  (%p1852_p0), %s2004_s17, 2048, %s2002_s16, %s941_s6, %s1733_s12, %s1733_s12, %s1734_s25   ;;  %v1522_v41 = vpop.eup %1521 }
 0x1a4   : > { %s957_s30 = sshll.u32 %s1979_s2, 4  ;;  %663 = vst [vmem:[%s1979_s2 + $0x60] sm:$0xff] %v1520_v40  ;;  %666 = vst [vmem:[%s1979_s2 + $0x78] sm:$0xff] %v1522_v41  ;;  %s2042_s11 = scalar_lea.hbm %s2098_s4, %s1188_s7  ;;  %v1524_v24 = vpop.eup %1523  ;;  %s2044_s30 = int_to_ptr.vmem [resolvable:$true] %s957_s30 }
 0x1a5   : > { %664 = vst [vmem:[%s1979_s2 + $0x68] sm:$0xff] %v1524_v24  ;;  %s936_s17 = scalar_lea.sflag [#allocation4], %s1901_s9  ;;  %s1633_s16 = scalar_lea.vmem %s2044_s30, 2048 }
 0x1a6   : > { %p1634_p4 = scmp.ne.s32.totalorder %s2044_s30, %s1633_s16  ;;  %s1735_s6 = smov [#allocation8]  }
 0x1a7   : > { %s1637_s21 = sshll.u32 %s1735_s6, 4  ;;  %s1638_s21 = int_to_ptr.vmem [resolvable:$false] %s1637_s21 }
 0x1a8   : > { %p1635_p8 = pnand %p1634_p4, %p1852_p0  ;;  %s1639_s8 = scalar_lea.vmem %s1638_s21, 4096 }
 0x1a9   : > { %p1640_p5 = scmp.lt.s32.totalorder %s2044_s30, %s1638_s21  ;;  %p1641_p7 = scmp.lt.s32.totalorder %s1639_s8, %s1633_s16 }
 0x1aa   : > { %p1636_p10 = pneg %p1635_p8 }
 0x1ab   : > { %p1642_p11 = por %p1641_p7, %p1640_p5 }
 0x1ad   : > { %p1643_p2 = pnand %p1642_p11, %p1636_p10 }
 0x1af   : > { %1646 = shalt.err (!%p1643_p2)
}
 0x1b0   : > { %s1647_s2 = scalar_lea.hbm %s2042_s11, 2048  ;;  %s1651_s22 = scalar_lea.hbm %s2098_s4, 4096 }
 0x1b1   : > { %p1648_p6 = scmp.ne.s32.totalorder %s2042_s11, %s1647_s2  ;;  %p1652_p13 = scmp.lt.s32.totalorder %s2042_s11, %s2098_s4 }
 0x1b2   : > { %p1653_p3 = scmp.lt.s32.totalorder %s1651_s22, %s1647_s2 }
 0x1b3   : > { %p1649_p9 = pnand %p1648_p6, %p1852_p0 }
 0x1b4   : > { %p1654_p1 = por %p1653_p3, %p1652_p13 }
 0x1b5   : > { %p1650_p12 = pneg %p1649_p9 }
 0x1b7   : > { %p1655_p4 = pnand %p1654_p1, %p1650_p12 }
 0x1b9   : > { %1658 = shalt.err (!%p1655_p4)
}
 0x1ba   : > { %1294 = dma.vmem_to_hbm [thread:$0]  (%p1852_p0), %s2044_s30, 2048, %s2042_s11, %s936_s17, %s1733_s12, %s1733_s12, %s1734_s25  }
 0x1bb PF: > { %s990_s24 = sand.u32 1, %s1705_s18   ;;  %p2121_p8 = scmp.ne.s32.totalorder %s2109_s27, 0 }
 0x1bc   : > { %p2122_p10 = scmp.ge.s32.totalorder %s1725_s23, 2  ;;  %s991_s26 = scalar_lea.sflag [#allocation4], %s990_s24 }
 0x1be   : > { %p1310_p5 = pnand %p2122_p10, %p2121_p8 }
 0x1c0   : > { %p1311_p7 = pneg %p1310_p5 }
 0x1c2   : > { %1696 = dma.done.wait (%p1311_p7), %s991_s26, 2048  }
 0x1c3   : > { %1698 = vsyncadd (%p1311_p7), %s991_s26, 4294965248  ;;  %s1000_s13 = scalar_lea.sflag [#allocation10], %s990_s24 }
 0x1c4   : > { %1700 = dma.done.wait (%p1311_p7), %s1000_s13, 2048  }
 0x1c5   : > { %1702 = vsyncadd (%p1311_p7), %s1000_s13, 4294965248  ;;  %s28_s23 = sadd.s32 1, %s1725_s23   ;;  %s2123_s15 = sld [smem:[#allocation18_spill]] }
 0x1c6   : > { %p25_p11 = scmp.ge.s32.totalorder %s28_s23, 4   ;;  %s2124_s21 = sld [smem:[#allocation16_spill]] }
 0x1c7   : > { %s2125_s22 = sld [smem:[#allocation17_spill]]  ;;  %s2126_s18 = smov %s1709_s19 }
 0x1c8   : > { %s2127_s19 = smov %s1713_s20  ;;  %27 = sbr.rel (!%p25_p11) target bundleno = 12 (0xc), region = 119 }
 0x1cb   : > { %s2128_s20 = smov %s2123_s15 }
 0x1cd   :  { %1005 = vsyncpa [#allocation3], 1 }
 0x1ce   :  { %1007 = vsyncpa [#allocation3 + $0x1], 1 }
 0x1cf   :  { %1008 = vsyncpa [#allocation6], 1 }
 0x1d0   :  { %1010 = vsyncpa [#allocation6 + $0x1], 1 }
 0x1d1   :  { %1011 = vsyncpa [#allocation4], 1 }
 0x1d2   :  { %1013 = vsyncpa [#allocation4 + $0x1], 1 }
 0x1d3   :  { %1014 = vsyncpa [#allocation10], 1 }
 0x1d4   :  { %1016 = vsyncpa [#allocation10 + $0x1], 1 }

</bundles_post_ra>
